<compile_context>
chip_gen: v6e
topology: v6e:2x2x1
jax: 0.10.0
libtpu: 0.0.40
codegen_flags: <defaults>
</compile_context>

<pallas_src>
import functools

import numpy as np
import jax
import jax.numpy as jnp
from jax.experimental import pallas as pl
from jax.experimental.pallas import tpu as pltpu


# ---------------------------------------------------------------------------
# demo1 configuration of CnnTextDependentModel
# ---------------------------------------------------------------------------
IN_CHANNELS = 80
CONV_CHANNELS = 16
KERNEL = 3
STRIDE = 3
FF_HIDDEN = 32
BN_EPS = 1e-5

# Row offsets into the packed parameter buffer (lane width = 32).
OFF_W1 = 0                                    # (240, 16)  conv1 flat (BN folded)
OFF_W2 = OFF_W1 + KERNEL * IN_CHANNELS        # (48, 16)   conv2 flat
OFF_W3 = OFF_W2 + KERNEL * CONV_CHANNELS      # (48, 16)   conv3 flat
OFF_FW1 = OFF_W3 + KERNEL * CONV_CHANNELS     # (16, 32)   ff1
OFF_FW2 = OFF_FW1 + CONV_CHANNELS             # (32, 32)   ff2
OFF_B = OFF_FW2 + FF_HIDDEN                   # 5 bias rows: b1,b2,b3,fb1,fb2
PACKED_ROWS = OFF_B + 5
PACKED_ROWS_PADDED = ((PACKED_ROWS + 7) // 8) * 8
PACKED_WIDTH = FF_HIDDEN                      # 32 lanes


def _conv_out_len(t):
    return (t - KERNEL) // STRIDE + 1


# ---------------------------------------------------------------------------
# Fused Pallas kernel: conv1(BN-folded) -> conv2 -> conv3 -> FF1 -> FF2
# ---------------------------------------------------------------------------
def _fused_kernel(p1_ref, prm_ref, out_ref, h1_ref, h2_ref, *, batch, t1, t2, t3):
    f32 = jnp.float32
    C = CONV_CHANNELS
    F = FF_HIDDEN

    # ---- Static slices of the packed parameter buffer (free ref views).
    w1 = prm_ref[OFF_W1:OFF_W1 + KERNEL * IN_CHANNELS, 0:C]      # (240, 16)
    w2 = prm_ref[OFF_W2:OFF_W2 + KERNEL * C, 0:C]                # (48, 16)
    w3 = prm_ref[OFF_W3:OFF_W3 + KERNEL * C, 0:C]                # (48, 16)
    fw1 = prm_ref[OFF_FW1:OFF_FW1 + C, 0:F]                      # (16, 32)
    fw2 = prm_ref[OFF_FW2:OFF_FW2 + F, 0:F]                      # (32, 32)
    b1 = prm_ref[OFF_B + 0:OFF_B + 1, 0:C]                       # (1, 16)
    b2 = prm_ref[OFF_B + 1:OFF_B + 2, 0:C]
    b3 = prm_ref[OFF_B + 2:OFF_B + 3, 0:C]
    fb1 = prm_ref[OFF_B + 3:OFF_B + 4, 0:F]                      # (1, 32)
    fb2 = prm_ref[OFF_B + 4:OFF_B + 5, 0:F]

    # ---- Conv1dBlock 1 (BatchNorm folded into weights): one patch-matmul + ReLU
    # over the whole flattened batch (B*t1 rows, K=240).
    h1 = jnp.maximum(
        jnp.dot(p1_ref[...], w1, preferred_element_type=f32) + b1, 0.0)   # (B*t1, 16)
    h1_ref[...] = h1  # stage in VMEM so taps can be read back with strided slices

    # ---- Conv1dBlock 2: stride==kernel conv as ONE patch-matmul per batch.
    # Tap j of window t is row 3*t + j -> strided sublane slice, lane-concat to 48.
    for b in range(batch):
        taps = [h1_ref[pl.ds(b * t1 + j, t2, stride=STRIDE), :] for j in range(KERNEL)]
        p2 = jnp.concatenate(taps, axis=-1)                                # (t2, 48)
        h2 = jnp.maximum(jnp.dot(p2, w2, preferred_element_type=f32) + b2, 0.0)
        h2_ref[b * t2:(b + 1) * t2, :] = h2                                # (t2, 16)

    # ---- Conv1dBlock 3: same trick, then re-stack the batch rows.
    h3_parts = []
    for b in range(batch):
        taps = [h2_ref[pl.ds(b * t2 + j, t3, stride=STRIDE), :] for j in range(KERNEL)]
        p3 = jnp.concatenate(taps, axis=-1)                                # (t3, 48)
        h3_parts.append(
            jnp.maximum(jnp.dot(p3, w3, preferred_element_type=f32) + b3, 0.0))
    h3 = jnp.concatenate(h3_parts, axis=0)                                 # (B*t3, 16)

    # ---- FeedForward: two Linear + ReLU (dropout is identity in eval mode).
    h = jnp.maximum(jnp.dot(h3, fw1, preferred_element_type=f32) + fb1, 0.0)
    h = jnp.maximum(jnp.dot(h, fw2, preferred_element_type=f32) + fb2, 0.0)
    out_ref[...] = h                                                       # (B*t3, 32)


def forward(fused, x):
    B, T, C = x.shape
    t1 = _conv_out_len(T)
    t2 = _conv_out_len(t1)
    t3 = _conv_out_len(t2)

    # stride == kernel: non-overlapping patches -> a plain (free) reshape, and the
    # batch is flattened into rows so the kernel runs in a single grid step.
    patches1 = x[:, : t1 * STRIDE, :].reshape(B * t1, STRIDE * C)
    packed = fused["packed"]

    kernel = functools.partial(_fused_kernel, batch=B, t1=t1, t2=t2, t3=t3)
    out = pl.pallas_call(
        kernel,
        out_shape=jax.ShapeDtypeStruct((B * t3, FF_HIDDEN), jnp.float32),
        grid=(1,),
        in_specs=[
            pl.BlockSpec((B * t1, STRIDE * C), lambda i: (0, 0)),
            pl.BlockSpec(packed.shape, lambda i: (0, 0)),
        ],
        out_specs=pl.BlockSpec((B * t3, FF_HIDDEN), lambda i: (0, 0)),
        scratch_shapes=[
            pltpu.VMEM((B * t1, CONV_CHANNELS), jnp.float32),   # conv1 activations
            pltpu.VMEM((B * t2, CONV_CHANNELS), jnp.float32),   # conv2 activations
        ],
        compiler_params=pltpu.CompilerParams(dimension_semantics=("arbitrary",)),
    )(patches1, packed)
    return out.reshape(B, t3, FF_HIDDEN)


# ---------------------------------------------------------------------------
# Parameter construction (PyTorch-style raw params + packed/prepped params)
# ---------------------------------------------------------------------------
def init_params(key):
    keys = jax.random.split(key, 10)

    def uinit(k, shape, fan_in):
        bound = 1.0 / np.sqrt(fan_in)
        return jax.random.uniform(k, shape, jnp.float32, -bound, bound)

    raw = {
        # Conv1d weights in PyTorch layout (out, in, k)
        "conv1_w": uinit(keys[0], (CONV_CHANNELS, IN_CHANNELS, KERNEL), IN_CHANNELS * KERNEL),
        "conv1_b": uinit(keys[1], (CONV_CHANNELS,), IN_CHANNELS * KERNEL),
        "conv2_w": uinit(keys[2], (CONV_CHANNELS, CONV_CHANNELS, KERNEL), CONV_CHANNELS * KERNEL),
        "conv2_b": uinit(keys[3], (CONV_CHANNELS,), CONV_CHANNELS * KERNEL),
        "conv3_w": uinit(keys[4], (CONV_CHANNELS, CONV_CHANNELS, KERNEL), CONV_CHANNELS * KERNEL),
        "conv3_b": uinit(keys[5], (CONV_CHANNELS,), CONV_CHANNELS * KERNEL),
        # BatchNorm1d(80) eval-mode defaults (block 1 only)
        "bn_gamma": jnp.ones((IN_CHANNELS,), jnp.float32),
        "bn_beta": jnp.zeros((IN_CHANNELS,), jnp.float32),
        "bn_mean": jnp.zeros((IN_CHANNELS,), jnp.float32),
        "bn_var": jnp.ones((IN_CHANNELS,), jnp.float32),
        # FeedForward (stored as (in, out) for direct matmul)
        "ff1_w": uinit(keys[6], (CONV_CHANNELS, FF_HIDDEN), CONV_CHANNELS),
        "ff1_b": uinit(keys[7], (FF_HIDDEN,), CONV_CHANNELS),
        "ff2_w": uinit(keys[8], (FF_HIDDEN, FF_HIDDEN), FF_HIDDEN),
        "ff2_b": uinit(keys[9], (FF_HIDDEN,), FF_HIDDEN),
    }
    return raw


def prepare_fused_params(raw):
    # Conv as patch-matmul: w_flat[(j*C_in + c), o] = w[o, c, j].
    w1_flat = jnp.transpose(raw["conv1_w"], (2, 1, 0)).reshape(
        KERNEL * IN_CHANNELS, CONV_CHANNELS)
    # Fold eval-mode BatchNorm of the conv1 INPUT into the weights/bias (exact).
    s = raw["bn_gamma"] / jnp.sqrt(raw["bn_var"] + BN_EPS)
    sh = raw["bn_beta"] - raw["bn_mean"] * s
    w1 = w1_flat * jnp.tile(s, KERNEL)[:, None]
    b1 = raw["conv1_b"] + jnp.tile(sh, KERNEL) @ w1_flat

    w2 = jnp.transpose(raw["conv2_w"], (2, 1, 0)).reshape(
        KERNEL * CONV_CHANNELS, CONV_CHANNELS)
    w3 = jnp.transpose(raw["conv3_w"], (2, 1, 0)).reshape(
        KERNEL * CONV_CHANNELS, CONV_CHANNELS)

    # Pack everything into one (rows, 32) f32 buffer -> a single parameter DMA.
    def pad_w(a):
        return jnp.pad(a, ((0, 0), (0, PACKED_WIDTH - a.shape[1])))

    blocks = [
        pad_w(w1),                                   # rows OFF_W1 .. +240
        pad_w(w2),                                   # rows OFF_W2 .. +48
        pad_w(w3),                                   # rows OFF_W3 .. +48
        pad_w(raw["ff1_w"]),                         # rows OFF_FW1 .. +16
        pad_w(raw["ff2_w"]),                         # rows OFF_FW2 .. +32
        pad_w(b1.reshape(1, -1)),                    # row OFF_B + 0
        pad_w(raw["conv2_b"].reshape(1, -1)),        # row OFF_B + 1
        pad_w(raw["conv3_b"].reshape(1, -1)),        # row OFF_B + 2
        pad_w(raw["ff1_b"].reshape(1, -1)),          # row OFF_B + 3
        pad_w(raw["ff2_b"].reshape(1, -1)),          # row OFF_B + 4
    ]
    packed = jnp.concatenate(blocks, axis=0)
    assert packed.shape == (PACKED_ROWS, PACKED_WIDTH)
    packed = jnp.pad(packed, ((0, PACKED_ROWS_PADDED - PACKED_ROWS), (0, 0)))
    return {"packed": packed}


# ---------------------------------------------------------------------------
# Pure-JAX reference (mirrors the PyTorch module, eval mode) for validation
# ---------------------------------------------------------------------------
def reference_forward(raw, x):
    def conv_block(x, w, b, bn=False):
        B, T, C = x.shape
        if bn:
            x = ((x - raw["bn_mean"]) / jnp.sqrt(raw["bn_var"] + BN_EPS)
                 * raw["bn_gamma"] + raw["bn_beta"])
        t_out = _conv_out_len(T)
        idx = (jnp.arange(t_out) * STRIDE)[:, None] + jnp.arange(KERNEL)[None, :]
        patches = x[:, idx, :]                                   # (B, t_out, K, C)
        y = jnp.einsum("btkc,ock->bto", patches, w) + b
        return jax.nn.relu(y)

    h = conv_block(x, raw["conv1_w"], raw["conv1_b"], bn=True)
    h = conv_block(h, raw["conv2_w"], raw["conv2_b"])
    h = conv_block(h, raw["conv3_w"], raw["conv3_b"])
    h = jax.nn.relu(h @ raw["ff1_w"] + raw["ff1_b"])
    h = jax.nn.relu(h @ raw["ff2_w"] + raw["ff2_b"])
    return h


if __name__ == "__main__":
    key = jax.random.PRNGKey(0)
    pkey, xkey = jax.random.split(key)
    raw = init_params(pkey)
    fused = prepare_fused_params(raw)

    # demo1 input shape: (batch=2, seq=125, features=80)
    x = jax.random.normal(xkey, (2, 125, IN_CHANNELS), dtype=jnp.float32)

    out = jax.jit(forward)(fused, x)
    out = jax.block_until_ready(out)

    assert out.shape == (2, 4, FF_HIDDEN), out.shape
    assert bool(jnp.all(jnp.isfinite(out)))

    # Reference in full-f32 matmul precision; the Pallas kernel keeps f32 operands,
    # so a tight tolerance actually catches layout / BN-fold regressions.
    with jax.default_matmul_precision("highest"):
        ref = jax.jit(reference_forward)(raw, x)
    np.testing.assert_allclose(np.asarray(out), np.asarray(ref), rtol=1e-4, atol=1e-4)

    print("KERNEL_OK")
</pallas_src>

<mosaic_0001>
module attributes {stable_mosaic.version = 11 : i64} {
  func.func @_fused_kernel(%arg0: i32, %arg1: memref<82x240xf32, #tpu.memory_space<vmem>>, %arg2: memref<392x32xf32, #tpu.memory_space<vmem>>, %arg3: memref<8x32xf32, #tpu.memory_space<vmem>>, %arg4: memref<82x16xf32, #tpu.memory_space<vmem>>, %arg5: memref<26x16xf32, #tpu.memory_space<vmem>>) attributes {dimension_semantics = [#tpu.dimension_semantics<arbitrary>], iteration_bounds = array<i64: 1>, scalar_prefetch = 0 : i64, scratch_operands = 2 : i64, tpu.core_type = #tpu.core_type<tc>, window_params = [{pipeline_mode = #tpu.pipeline_mode<synchronous>, transform_indices = @transform_0, window_bounds = array<i64: 82, 240>}, {pipeline_mode = #tpu.pipeline_mode<synchronous>, transform_indices = @transform_1, window_bounds = array<i64: 392, 32>}, {pipeline_mode = #tpu.pipeline_mode<synchronous>, transform_indices = @transform_2, window_bounds = array<i64: 8, 32>}]} {
    %c0 = arith.constant 0 : index
    %c0_0 = arith.constant 0 : index
    %0 = vector.load %arg2[%c0, %c0_0] : memref<392x32xf32, #tpu.memory_space<vmem>>, vector<240x16xf32>
    %c240 = arith.constant 240 : index
    %c0_1 = arith.constant 0 : index
    %1 = vector.load %arg2[%c240, %c0_1] : memref<392x32xf32, #tpu.memory_space<vmem>>, vector<48x16xf32>
    %c288 = arith.constant 288 : index
    %c0_2 = arith.constant 0 : index
    %2 = vector.load %arg2[%c288, %c0_2] : memref<392x32xf32, #tpu.memory_space<vmem>>, vector<48x16xf32>
    %c336 = arith.constant 336 : index
    %c0_3 = arith.constant 0 : index
    %3 = vector.load %arg2[%c336, %c0_3] : memref<392x32xf32, #tpu.memory_space<vmem>>, vector<16x32xf32>
    %c352 = arith.constant 352 : index
    %c0_4 = arith.constant 0 : index
    %4 = vector.load %arg2[%c352, %c0_4] : memref<392x32xf32, #tpu.memory_space<vmem>>, vector<32x32xf32>
    %c384 = arith.constant 384 : index
    %c0_5 = arith.constant 0 : index
    %5 = vector.load %arg2[%c384, %c0_5] : memref<392x32xf32, #tpu.memory_space<vmem>>, vector<1x16xf32>
    %c385 = arith.constant 385 : index
    %c0_6 = arith.constant 0 : index
    %6 = vector.load %arg2[%c385, %c0_6] : memref<392x32xf32, #tpu.memory_space<vmem>>, vector<1x16xf32>
    %c386 = arith.constant 386 : index
    %c0_7 = arith.constant 0 : index
    %7 = vector.load %arg2[%c386, %c0_7] : memref<392x32xf32, #tpu.memory_space<vmem>>, vector<1x16xf32>
    %c387 = arith.constant 387 : index
    %c0_8 = arith.constant 0 : index
    %8 = vector.load %arg2[%c387, %c0_8] : memref<392x32xf32, #tpu.memory_space<vmem>>, vector<1x32xf32>
    %c388 = arith.constant 388 : index
    %c0_9 = arith.constant 0 : index
    %9 = vector.load %arg2[%c388, %c0_9] : memref<392x32xf32, #tpu.memory_space<vmem>>, vector<1x32xf32>
    %c0_10 = arith.constant 0 : index
    %c0_11 = arith.constant 0 : index
    %10 = vector.load %arg1[%c0_10, %c0_11] : memref<82x240xf32, #tpu.memory_space<vmem>>, vector<82x240xf32>
    %cst = arith.constant dense<0.000000e+00> : vector<82x16xf32>
    %11 = tpu.matmul %10, %0, %cst {dimension_numbers = #tpu.dot_dimension_numbers<[1], [0], [0], [1], [0, 0, 1, 1], [], []>} : vector<82x240xf32>, vector<240x16xf32>, vector<82x16xf32> -> vector<82x16xf32>
    %12 = vector.broadcast %5 : vector<1x16xf32> to vector<82x16xf32>
    %13 = arith.addf %11, %12 : vector<82x16xf32>
    %cst_12 = arith.constant 0.000000e+00 : f32
    %14 = vector.broadcast %cst_12 : f32 to vector<82x16xf32>
    %15 = arith.maximumf %13, %14 : vector<82x16xf32>
    %c0_13 = arith.constant 0 : index
    %c0_14 = arith.constant 0 : index
    %16 = vector.load %arg4[%c0_13, %c0_14] : memref<82x16xf32, #tpu.memory_space<vmem>>, vector<82x16xf32>
    tpu.vector_store %arg4[%c0_13, %c0_14], %15 {strides = array<i32>} : memref<82x16xf32, #tpu.memory_space<vmem>>, vector<82x16xf32>,
    %c0_15 = arith.constant 0 : index
    %c0_16 = arith.constant 0 : index
    %17 = tpu.strided_load %arg4[%c0_15, %c0_16] {strides = array<i32: 3, 1>} : memref<82x16xf32, #tpu.memory_space<vmem>>, vector<13x16xf32>
    %c1 = arith.constant 1 : index
    %c0_17 = arith.constant 0 : index
    %18 = tpu.strided_load %arg4[%c1, %c0_17] {strides = array<i32: 3, 1>} : memref<82x16xf32, #tpu.memory_space<vmem>>, vector<13x16xf32>
    %c2 = arith.constant 2 : index
    %c0_18 = arith.constant 0 : index
    %19 = tpu.strided_load %arg4[%c2, %c0_18] {strides = array<i32: 3, 1>} : memref<82x16xf32, #tpu.memory_space<vmem>>, vector<13x16xf32>
    %20 = tpu.concatenate %17, %18, %19 in 1 : vector<13x16xf32>, vector<13x16xf32>, vector<13x16xf32> -> vector<13x48xf32>
    %cst_19 = arith.constant dense<0.000000e+00> : vector<13x16xf32>
    %21 = tpu.matmul %20, %1, %cst_19 {dimension_numbers = #tpu.dot_dimension_numbers<[1], [0], [0], [1], [0, 0, 1, 1], [], []>} : vector<13x48xf32>, vector<48x16xf32>, vector<13x16xf32> -> vector<13x16xf32>
    %22 = vector.broadcast %6 : vector<1x16xf32> to vector<13x16xf32>
    %23 = arith.addf %21, %22 : vector<13x16xf32>
    %cst_20 = arith.constant 0.000000e+00 : f32
    %24 = vector.broadcast %cst_20 : f32 to vector<13x16xf32>
    %25 = arith.maximumf %23, %24 : vector<13x16xf32>
    %c0_21 = arith.constant 0 : index
    %c0_22 = arith.constant 0 : index
    %26 = vector.load %arg5[%c0_21, %c0_22] : memref<26x16xf32, #tpu.memory_space<vmem>>, vector<13x16xf32>
    tpu.vector_store %arg5[%c0_21, %c0_22], %25 {strides = array<i32>} : memref<26x16xf32, #tpu.memory_space<vmem>>, vector<13x16xf32>,
    %c41 = arith.constant 41 : index
    %c0_23 = arith.constant 0 : index
    %27 = tpu.strided_load %arg4[%c41, %c0_23] {strides = array<i32: 3, 1>} : memref<82x16xf32, #tpu.memory_space<vmem>>, vector<13x16xf32>
    %c42 = arith.constant 42 : index
    %c0_24 = arith.constant 0 : index
    %28 = tpu.strided_load %arg4[%c42, %c0_24] {strides = array<i32: 3, 1>} : memref<82x16xf32, #tpu.memory_space<vmem>>, vector<13x16xf32>
    %c43 = arith.constant 43 : index
    %c0_25 = arith.constant 0 : index
    %29 = tpu.strided_load %arg4[%c43, %c0_25] {strides = array<i32: 3, 1>} : memref<82x16xf32, #tpu.memory_space<vmem>>, vector<13x16xf32>
    %30 = tpu.concatenate %27, %28, %29 in 1 : vector<13x16xf32>, vector<13x16xf32>, vector<13x16xf32> -> vector<13x48xf32>
    %cst_26 = arith.constant dense<0.000000e+00> : vector<13x16xf32>
    %31 = tpu.matmul %30, %1, %cst_26 {dimension_numbers = #tpu.dot_dimension_numbers<[1], [0], [0], [1], [0, 0, 1, 1], [], []>} : vector<13x48xf32>, vector<48x16xf32>, vector<13x16xf32> -> vector<13x16xf32>
    %32 = vector.broadcast %6 : vector<1x16xf32> to vector<13x16xf32>
    %33 = arith.addf %31, %32 : vector<13x16xf32>
    %cst_27 = arith.constant 0.000000e+00 : f32
    %34 = vector.broadcast %cst_27 : f32 to vector<13x16xf32>
    %35 = arith.maximumf %33, %34 : vector<13x16xf32>
    %c13 = arith.constant 13 : index
    %c0_28 = arith.constant 0 : index
    %36 = vector.load %arg5[%c13, %c0_28] : memref<26x16xf32, #tpu.memory_space<vmem>>, vector<13x16xf32>
    tpu.vector_store %arg5[%c13, %c0_28], %35 {strides = array<i32>} : memref<26x16xf32, #tpu.memory_space<vmem>>, vector<13x16xf32>,
    %c0_29 = arith.constant 0 : index
    %c0_30 = arith.constant 0 : index
    %37 = tpu.strided_load %arg5[%c0_29, %c0_30] {strides = array<i32: 3, 1>} : memref<26x16xf32, #tpu.memory_space<vmem>>, vector<4x16xf32>
    %c1_31 = arith.constant 1 : index
    %c0_32 = arith.constant 0 : index
    %38 = tpu.strided_load %arg5[%c1_31, %c0_32] {strides = array<i32: 3, 1>} : memref<26x16xf32, #tpu.memory_space<vmem>>, vector<4x16xf32>
    %c2_33 = arith.constant 2 : index
    %c0_34 = arith.constant 0 : index
    %39 = tpu.strided_load %arg5[%c2_33, %c0_34] {strides = array<i32: 3, 1>} : memref<26x16xf32, #tpu.memory_space<vmem>>, vector<4x16xf32>
    %40 = tpu.concatenate %37, %38, %39 in 1 : vector<4x16xf32>, vector<4x16xf32>, vector<4x16xf32> -> vector<4x48xf32>
    %cst_35 = arith.constant dense<0.000000e+00> : vector<4x16xf32>
    %41 = tpu.matmul %40, %2, %cst_35 {dimension_numbers = #tpu.dot_dimension_numbers<[1], [0], [0], [1], [0, 0, 1, 1], [], []>} : vector<4x48xf32>, vector<48x16xf32>, vector<4x16xf32> -> vector<4x16xf32>
    %42 = vector.broadcast %7 : vector<1x16xf32> to vector<4x16xf32>
    %43 = arith.addf %41, %42 : vector<4x16xf32>
    %cst_36 = arith.constant 0.000000e+00 : f32
    %44 = vector.broadcast %cst_36 : f32 to vector<4x16xf32>
    %45 = arith.maximumf %43, %44 : vector<4x16xf32>
    %c13_37 = arith.constant 13 : index
    %c0_38 = arith.constant 0 : index
    %46 = tpu.strided_load %arg5[%c13_37, %c0_38] {strides = array<i32: 3, 1>} : memref<26x16xf32, #tpu.memory_space<vmem>>, vector<4x16xf32>
    %c14 = arith.constant 14 : index
    %c0_39 = arith.constant 0 : index
    %47 = tpu.strided_load %arg5[%c14, %c0_39] {strides = array<i32: 3, 1>} : memref<26x16xf32, #tpu.memory_space<vmem>>, vector<4x16xf32>
    %c15 = arith.constant 15 : index
    %c0_40 = arith.constant 0 : index
    %48 = tpu.strided_load %arg5[%c15, %c0_40] {strides = array<i32: 3, 1>} : memref<26x16xf32, #tpu.memory_space<vmem>>, vector<4x16xf32>
    %49 = tpu.concatenate %46, %47, %48 in 1 : vector<4x16xf32>, vector<4x16xf32>, vector<4x16xf32> -> vector<4x48xf32>
    %cst_41 = arith.constant dense<0.000000e+00> : vector<4x16xf32>
    %50 = tpu.matmul %49, %2, %cst_41 {dimension_numbers = #tpu.dot_dimension_numbers<[1], [0], [0], [1], [0, 0, 1, 1], [], []>} : vector<4x48xf32>, vector<48x16xf32>, vector<4x16xf32> -> vector<4x16xf32>
    %51 = vector.broadcast %7 : vector<1x16xf32> to vector<4x16xf32>
    %52 = arith.addf %50, %51 : vector<4x16xf32>
    %cst_42 = arith.constant 0.000000e+00 : f32
    %53 = vector.broadcast %cst_42 : f32 to vector<4x16xf32>
    %54 = arith.maximumf %52, %53 : vector<4x16xf32>
    %55 = tpu.concatenate %45, %54 in 0 : vector<4x16xf32>, vector<4x16xf32> -> vector<8x16xf32>
    %cst_43 = arith.constant dense<0.000000e+00> : vector<8x32xf32>
    %56 = tpu.matmul %55, %3, %cst_43 {dimension_numbers = #tpu.dot_dimension_numbers<[1], [0], [0], [1], [0, 0, 1, 1], [], []>} : vector<8x16xf32>, vector<16x32xf32>, vector<8x32xf32> -> vector<8x32xf32>
    %57 = vector.broadcast %8 : vector<1x32xf32> to vector<8x32xf32>
    %58 = arith.addf %56, %57 : vector<8x32xf32>
    %cst_44 = arith.constant 0.000000e+00 : f32
    %59 = vector.broadcast %cst_44 : f32 to vector<8x32xf32>
    %60 = arith.maximumf %58, %59 : vector<8x32xf32>
    %cst_45 = arith.constant dense<0.000000e+00> : vector<8x32xf32>
    %61 = tpu.matmul %60, %4, %cst_45 {dimension_numbers = #tpu.dot_dimension_numbers<[1], [0], [0], [1], [0, 0, 1, 1], [], []>} : vector<8x32xf32>, vector<32x32xf32>, vector<8x32xf32> -> vector<8x32xf32>
    %62 = vector.broadcast %9 : vector<1x32xf32> to vector<8x32xf32>
    %63 = arith.addf %61, %62 : vector<8x32xf32>
    %cst_46 = arith.constant 0.000000e+00 : f32
    %64 = vector.broadcast %cst_46 : f32 to vector<8x32xf32>
    %65 = arith.maximumf %63, %64 : vector<8x32xf32>
    %c0_47 = arith.constant 0 : index
    %c0_48 = arith.constant 0 : index
    %66 = vector.load %arg3[%c0_47, %c0_48] : memref<8x32xf32, #tpu.memory_space<vmem>>, vector<8x32xf32>
    tpu.vector_store %arg3[%c0_47, %c0_48], %65 {strides = array<i32>} : memref<8x32xf32, #tpu.memory_space<vmem>>, vector<8x32xf32>,
    return
  }
  func.func @transform_0(%arg0: i32) -> (i32, i32) {
    %c0_i32 = arith.constant 0 : i32
    %c0_i32_0 = arith.constant 0 : i32
    %c0_i32_1 = arith.constant 0 : i32
    return %c0_i32, %c0_i32_0 : i32, i32
  }
  func.func @transform_1(%arg0: i32) -> (i32, i32) {
    %c0_i32 = arith.constant 0 : i32
    %c0_i32_0 = arith.constant 0 : i32
    %c0_i32_1 = arith.constant 0 : i32
    return %c0_i32, %c0_i32_0 : i32, i32
  }
  func.func @transform_2(%arg0: i32) -> (i32, i32) {
    %c0_i32 = arith.constant 0 : i32
    %c0_i32_0 = arith.constant 0 : i32
    %c0_i32_1 = arith.constant 0 : i32
    return %c0_i32, %c0_i32_0 : i32, i32
  }
}

</mosaic_0001>

<bundles_post_ra>
// kernel: forward.1
= control target key start
LH: loop header
LB: loop body
LE: loop exit
PB: predicated region body
PF: predicated region fallthrough
CT: control target
= control target key end

     0   :  { %v1035_v1 = vmov 0.0   ;;  %vm91_vm0 = vcmask 916480   ;;  %s1445_s0 = inlined_call_operand.vmem [shape: f32[82,240], index: 0, kind: input, shape index: {}]   ;;  %s1446_s1 = inlined_call_operand.vmem [shape: f32[392,32], index: 1, kind: input, shape index: {}]   ;;  %s1447_s2 = inlined_call_operand.hbm [shape: f32[8,32], index: 2, kind: output, shape index: {}]  }
   0x1   :  { %v27_v0 = vld [vmem:[%s1446_s1 + $0x78] sm:$0xff]  ;;  %125 = vmatprep.subr.mxu0 %v1035_v1  ;;  %v26_v2 = vld [vmem:[%s1446_s1 + $0x70] sm:$0xff]  ;;  %v25_v3 = vld [vmem:[%s1446_s1 + $0x68] sm:$0xff] }
   0x2   :  { %126 = vmatpush1.msra.mxu0 %v27_v0  ;;  %v24_v4 = vld [vmem:[%s1446_s1 + $0x60] sm:$0xff]  ;;  %v23_v5 = vld [vmem:[%s1446_s1 + $0x58] sm:$0xff]  ;;  %v22_v6 = vld [vmem:[%s1446_s1 + $0x50] sm:$0xff] }
   0x3   :  { %127 = vmatprep.subr.mxu0 %v1035_v1  ;;  %v66_v7 = vld [vmem:[%s1445_s0 + $0x8] sm:$0xff]  ;;  %v20_v9 = vld [vmem:[%s1446_s1 + $0x40] sm:$0xff]  ;;  %v19_v10 = vld [vmem:[%s1446_s1 + $0x38] sm:$0xff] }
   0x4   :  { %128 = vmatpush1.msra.mxu0 %v26_v2  ;;  %v21_v8 = vld [vmem:[%s1446_s1 + $0x48] sm:$0xff]  ;;  %869 = vmatprep.mubr.msk.f32.mxu0 %vm91_vm0, %v66_v7  ;;  %v18_v11 = vld [vmem:[%s1446_s1 + $0x30] sm:$0xff] }
   0x5   :  { %129 = vmatprep.subr.mxu0 %v1035_v1 }
   0x6   :  { %130 = vmatpush1.msra.mxu0 %v25_v3 }
   0x7   :  { %131 = vmatprep.subr.mxu0 %v1035_v1 }
   0x8   :  { %132 = vmatpush1.msra.mxu0 %v24_v4 }
   0x9   :  { %133 = vmatprep.subr.mxu0 %v1035_v1 }
   0xa   :  { %134 = vmatpush1.msra.mxu0 %v23_v5 }
   0xb   :  { %135 = vmatprep.subr.mxu0 %v1035_v1 }
   0xc   :  { %136 = vmatpush1.msra.mxu0 %v22_v6 }
   0xd   :  { %137 = vmatprep.subr.mxu0 %v1035_v1 }
   0xe   :  { %138 = vmatpush1.msra.mxu0 %v21_v8 }
   0xf   :  { %139 = vmatprep.subr.mxu0 %v1035_v1 }
  0x10   :  { %140 = vmatpush1.msra.mxu0 %v20_v9 }
  0x11   :  { %141 = vmatprep.subr.mxu0 %v1035_v1 }
  0x12   :  { %7 = vsyncpa [#allocation5], 0  ;;  %142 = vmatpush1.msra.mxu0 %v19_v10  ;;  %v17_v12 = vld [vmem:[%s1446_s1 + $0x28] sm:$0xff]  ;;  %v16_v13 = vld [vmem:[%s1446_s1 + $0x20] sm:$0xff]  ;;  %vm256_vm1 = vcmask 130048   ;;  %s1036_s11 = smov 32  }
  0x13   :  { %143 = vmatprep.subr.mxu0 %v1035_v1  ;;  %v15_v14 = vld [vmem:[%s1446_s1 + $0x18] sm:$0xff]  ;;  %v14_v15 = vld [vmem:[%s1446_s1 + $0x10] sm:$0xff]  ;;  %v13_v16 = vld [vmem:[%s1446_s1 + $0x8] sm:$0xff]  ;;  %s1037_s12 = smov 16   ;;  %vm298_vm2 = vcmask 261120   ;;  %vm305_vm3 = vcmask 392192  }
  0x14   :  { %144 = vmatpush1.msra.mxu0 %v18_v11  ;;  %v12_v17 = vld [vmem:[%s1446_s1] sm:$0xff]  ;;  %v41_v18 = vld [vmem:[%s1446_s1 + $0xe8] sm:$0xff]  ;;  %v39_v20 = vld [vmem:[%s1446_s1 + $0xd8] sm:$0xff]  ;;  %vm390_vm4 = vcmask 126976   ;;  %vm1038_vm5 = vmmov 0   ;;  %vm695_vm6 = vcmask 1043456  }
  0x15   :  { %145 = vmatprep.subr.mxu0 %v1035_v1  ;;  %v40_v19 = vld [vmem:[%s1446_s1 + $0xe0] sm:$0xff]  ;;  %v38_v21 = vld [vmem:[%s1446_s1 + $0xd0] sm:$0xff]  ;;  %v37_v22 = vld [vmem:[%s1446_s1 + $0xc8] sm:$0xff]  ;;  %s1039_s20 = smov [#allocation4]  }
  0x16   :  { %146 = vmatpush1.msra.mxu0 %v17_v12  ;;  %v36_v23 = vld [vmem:[%s1446_s1 + $0xc0] sm:$0xff]  ;;  %v35_v24 = vld [vmem:[%s1446_s1 + $0xb8] sm:$0xff]  ;;  %v34_v25 = vld [vmem:[%s1446_s1 + $0xb0] sm:$0xff]  ;;  %s860_s21 = sshll.u32 %s1039_s20, 4  ;;  %s861_s21 = int_to_ptr.vmem [resolvable:$true] %s860_s21 }
  0x17   :  { %147 = vmatprep.subr.mxu0 %v1035_v1  ;;  %v33_v26 = vld [vmem:[%s1446_s1 + $0xa8] sm:$0xff]  ;;  %v32_v27 = vld [vmem:[%s1446_s1 + $0xa0] sm:$0xff]  ;;  %v31_v28 = vld [vmem:[%s1446_s1 + $0x98] sm:$0xff]  ;;  %s1013_s22 = scalar_lea.vmem %s861_s21, 128  ;;  %p1018_p1 = scmp.lt.s32.totalorder %s861_s21, %s861_s21 }
  0x18   :  { %148 = vmatpush1.msra.mxu0 %v16_v13  ;;  %v30_v29 = vld [vmem:[%s1446_s1 + $0x90] sm:$0xff]  ;;  %v29_v30 = vld [vmem:[%s1446_s1 + $0x88] sm:$0xff]  ;;  %v28_v31 = vld [vmem:[%s1446_s1 + $0x80] sm:$0xff]  ;;  %p1014_p0 = scmp.ne.s32.totalorder %s861_s21, %s1013_s22  ;;  %p1019_p2 = scmp.lt.s32.totalorder %s1013_s22, %s1013_s22 }
  0x19   :  { %149 = vmatprep.subr.mxu0 %v1035_v1  ;;  %v65_v32 = vld [vmem:[%s1445_s0] sm:$0xff]  ;;  %v68_v33 = vld [vmem:[%s1445_s0 + $0x18] sm:$0xff]  ;;  %v67_v34 = vld [vmem:[%s1445_s0 + $0x10] sm:$0xff] }
  0x1a   :  { %150 = vmatpush1.msra.mxu0 %v15_v14  ;;  %v70_v35 = vld [vmem:[%s1445_s0 + $0x28] sm:$0xff]  ;;  %v69_v36 = vld [vmem:[%s1445_s0 + $0x20] sm:$0xff]  ;;  %v72_v37 = vld [vmem:[%s1445_s0 + $0x38] sm:$0xff]  ;;  %p1020_p3 = por %p1019_p2, %p1018_p1 }
  0x1b   :  { %151 = vmatprep.subr.mxu0 %v1035_v1  ;;  %v71_v38 = vld [vmem:[%s1445_s0 + $0x30] sm:$0xff]  ;;  %v74_v39 = vld [vmem:[%s1445_s0 + $0x48] sm:$0xff]  ;;  %v73_v40 = vld [vmem:[%s1445_s0 + $0x40] sm:$0xff] }
  0x1c   :  { %152 = vmatpush1.msra.mxu0 %v14_v15  ;;  %v76_v41 = vld [vmem:[%s1445_s0 + $0x58] sm:$0xff]  ;;  %v75_v42 = vld [vmem:[%s1445_s0 + $0x50] sm:$0xff]  ;;  %v78_v43 = vld [vmem:[%s1445_s0 + $0x68] sm:$0xff]  ;;  %p1021_p4 = pnand %p1020_p3, %p1014_p0 }
  0x1d   :  { %153 = vmatprep.subr.mxu0 %v1035_v1  ;;  %v77_v44 = vld [vmem:[%s1445_s0 + $0x60] sm:$0xff]  ;;  %v80_v45 = vld [vmem:[%s1445_s0 + $0x78] sm:$0xff]  ;;  %v79_v46 = vld [vmem:[%s1445_s0 + $0x70] sm:$0xff] }
  0x1e   :  { %154 = vmatpush1.msra.mxu0 %v13_v16  ;;  %v82_v47 = vld [vmem:[%s1445_s0 + $0x88] sm:$0xff]  ;;  %v81_v48 = vld [vmem:[%s1445_s0 + $0x80] sm:$0xff]  ;;  %v84_v49 = vld [vmem:[%s1445_s0 + $0x98] sm:$0xff] }
  0x1f   :  { %155 = vmatprep.subr.mxu0 %v1035_v1  ;;  %v83_v50 = vld [vmem:[%s1445_s0 + $0x90] sm:$0xff]  ;;  %v1248_v51 = vld [vmem:[%s1446_s1 + $0x118] sm:$0xff]  ;;  %v1255_v52 = vld [vmem:[%s1446_s1 + $0x180] ss:$0 sm:$0xff] }
  0x20   :  { %156 = vmatpush1.msra.mxu0 %v12_v17  ;;  %930 = vmatprep.subr.mxu1 %v1248_v51  ;;  %v1263_v61 = vld [vmem:[%s1446_s1 + $0x110] sm:$0xff]  ;;  %v1269_v63 = vld [vmem:[%s1446_s1 + $0x108] sm:$0xff]  ;;  %v1278_v3 = vld [vmem:[%s1446_s1 + $0x100] sm:$0xff] }
  0x21   :  { %161 = vmatprep.subr.mxu0 %v1035_v1  ;;  %931 = vmatpush3.msra.mxu1 %v1248_v51  ;;  %v1284_v5 = vld [vmem:[%s1446_s1 + $0xf8] sm:$0xff]  ;;  %v1295_v11 = vld [vmem:[%s1446_s1 + $0xf0] sm:$0xff] }
  0x22   :  { %162 = vmatpush2.msra.mxu0 %v41_v18  ;;  %932 = vmatprep.subr.mxu1 %v1263_v61 }
  0x23   :  { %163 = vmatprep.subr.mxu0 %v1035_v1  ;;  %933 = vmatpush3.msra.mxu1 %v1263_v61 }
  0x24   :  { %164 = vmatpush2.msra.mxu0 %v40_v19  ;;  %934 = vmatprep.subr.mxu1 %v1269_v63 }
  0x25   :  { %165 = vmatprep.subr.mxu0 %v1035_v1  ;;  %935 = vmatpush3.msra.mxu1 %v1269_v63 }
  0x26   :  { %166 = vmatpush2.msra.mxu0 %v39_v20  ;;  %936 = vmatprep.subr.mxu1 %v1278_v3 }
  0x27   :  { %167 = vmatprep.subr.mxu0 %v1035_v1  ;;  %937 = vmatpush3.msra.mxu1 %v1278_v3 }
  0x28   :  { %168 = vmatpush2.msra.mxu0 %v38_v21  ;;  %938 = vmatprep.subr.mxu1 %v1284_v5 }
  0x29   :  { %169 = vmatprep.subr.mxu0 %v1035_v1  ;;  %939 = vmatpush3.msra.mxu1 %v1284_v5 }
  0x2a   :  { %170 = vmatpush2.msra.mxu0 %v37_v22  ;;  %940 = vmatprep.subr.mxu1 %v1295_v11 }
  0x2b   :  { %171 = vmatprep.subr.mxu0 %v1035_v1  ;;  %941 = vmatpush3.msra.mxu1 %v1295_v11 }
  0x2c   :  { %172 = vmatpush2.msra.mxu0 %v36_v23  ;;  %945 = vmatprep.subr.mxu1 %v1248_v51 }
  0x2d   :  { %173 = vmatprep.subr.mxu0 %v1035_v1 }
  0x2e   :  { %174 = vmatpush2.msra.mxu0 %v35_v24 }
  0x2f   :  { %175 = vmatprep.subr.mxu0 %v1035_v1 }
  0x30   :  { %176 = vmatpush2.msra.mxu0 %v34_v25 }
  0x31   :  { %177 = vmatprep.subr.mxu0 %v1035_v1 }
  0x32   :  { %178 = vmatpush2.msra.mxu0 %v33_v26 }
  0x33   :  { %179 = vmatprep.subr.mxu0 %v1035_v1 }
  0x34   :  { %180 = vmatpush2.msra.mxu0 %v32_v27 }
  0x35   :  { %181 = vmatprep.subr.mxu0 %v1035_v1 }
  0x36   :  { %182 = vmatpush2.msra.mxu0 %v31_v28 }
  0x37   :  { %183 = vmatprep.subr.mxu0 %v1035_v1 }
  0x38   :  { %184 = vmatpush2.msra.mxu0 %v30_v29 }
  0x39   :  { %185 = vmatprep.subr.mxu0 %v1035_v1 }
  0x3a   :  { %186 = vmatpush2.msra.mxu0 %v29_v30 }
  0x3b   :  { %187 = vmatprep.subr.mxu0 %v1035_v1 }
  0x3c   :  { %188 = vmatpush2.msra.mxu0 %v28_v31 }
  0x3d   :  { %190 = vmatmul.mubr.f32.vlgmr.msra.gmra.mxu0 %v65_v32 }
  0x3e   :  { %870 = vmatprep.mubr.msk.f32.mxu0 %vm91_vm0, %v68_v33 }
  0x41   :  { %195 = vmatmul.mubr.f32.gmra.mxu0 %v67_v34 }
  0x42   :  { %871 = vmatprep.mubr.msk.f32.mxu0 %vm91_vm0, %v70_v35 }
  0x45   :  { %200 = vmatmul.mubr.f32.gmra.mxu0 %v69_v36 }
  0x46   :  { %872 = vmatprep.mubr.msk.f32.mxu0 %vm91_vm0, %v72_v37 }
  0x49   :  { %205 = vmatmul.mubr.f32.gmra.mxu0 %v71_v38 }
  0x4a   :  { %873 = vmatprep.mubr.msk.f32.mxu0 %vm91_vm0, %v74_v39 }
  0x4d   :  { %210 = vmatmul.mubr.f32.gmra.mxu0 %v73_v40 }
  0x4e   :  { %874 = vmatprep.mubr.msk.f32.mxu0 %vm91_vm0, %v76_v41 }
  0x51   :  { %215 = vmatmul.mubr.f32.gmra.mxu0 %v75_v42 }
  0x52   :  { %875 = vmatprep.mubr.msk.f32.mxu0 %vm91_vm0, %v78_v43 }
  0x55   :  { %220 = vmatmul.mubr.f32.gmra.mxu0 %v77_v44 }
  0x56   :  { %876 = vmatprep.mubr.msk.f32.mxu0 %vm91_vm0, %v80_v45 }
  0x59   :  { %225 = vmatmul.mubr.f32.gmra.mxu0 %v79_v46 }
  0x5a   :  { %877 = vmatprep.mubr.msk.f32.mxu0 %vm91_vm0, %v82_v47 }
  0x5d   :  { %230 = vmatmul.mubr.f32.gmra.mxu0 %v81_v48 }
  0x5e   :  { %878 = vmatprep.mubr.msk.f32.mxu0 %vm91_vm0, %v84_v49 }
  0x61   :  { %235 = vmatmul.mubr.f32.gmra.mxu0 %v83_v50 }
  0xfd   :  { %v191_v53 = vpop.f32.mrf.mxu0 }
  0xfe   :  { %v192_v54 = vadd.f32 %v1255_v52, %v191_v53 }
  0xff   :  { %v193_v55 = vpop.f32.mrf.mxu0 }
 0x100   :  { %v245_v56 = vmax.f32 %v192_v54, 0.0 }
 0x101   :  { %v196_v57 = vpop.f32.mrf.mxu0 }
 0x102   :  { %257 = vst.msk [vmem:[#allocation2] sm:$0xff] %vm256_vm1, %v245_v56  ;;  %v197_v58 = vadd.f32 %v1255_v52, %v196_v57 }
 0x103   :  { %v198_v59 = vpop.f32.mrf.mxu0 }
 0x104   :  { %v246_v60 = vmax.f32 %v197_v58, 0.0 }
 0x105   :  { %v201_v62 = vpop.f32.mrf.mxu0 }
 0x106   :  { %258 = vst.msk [vmem:[#allocation2 + $0x8] sm:$0xff] %vm256_vm1, %v246_v60  ;;  %v202_v0 = vadd.f32 %v1255_v52, %v201_v62 }
 0x107   :  { %v203_v2 = vpop.f32.mrf.mxu0 }
 0x108   :  { %v247_v4 = vmax.f32 %v202_v0, 0.0  ;;  %v52_v0 = vld [vmem:[%s1446_s1 + $0x140] sm:$0xff]  ;;  %v51_v2 = vld [vmem:[%s1446_s1 + $0x138] sm:$0xff] }
 0x109   :  { %v206_v6 = vpop.f32.mrf.mxu0 }
 0x10a   :  { %259 = vst.msk [vmem:[#allocation2 + $0x10] sm:$0xff] %vm256_vm1, %v247_v4  ;;  %v207_v7 = vadd.f32 %v1255_v52, %v206_v6  ;;  %v49_v4 = vld [vmem:[%s1446_s1 + $0x128] sm:$0xff] }
 0x10b   :  { %v208_v8 = vpop.f32.mrf.mxu0 }
 0x10c   :  { %v248_v9 = vmax.f32 %v207_v7, 0.0 }
 0x10d   :  { %v211_v10 = vpop.f32.mrf.mxu0 }
 0x10e   :  { %260 = vst.msk [vmem:[#allocation2 + $0x18] sm:$0xff] %vm256_vm1, %v248_v9  ;;  %v212_v12 = vadd.f32 %v1255_v52, %v211_v10 }
 0x10f   :  { %v213_v13 = vpop.f32.mrf.mxu0 }
 0x110   :  { %v249_v14 = vmax.f32 %v212_v12, 0.0 }
 0x111   :  { %v216_v15 = vpop.f32.mrf.mxu0  ;;  %v277_v16 = vld [vmem:[#allocation2 + $0x2] ss:$3 sm:$0xff]  ;;  %v273_v17 = vld [vmem:[#allocation2 + $0x1] ss:$3 sm:$0xff]  ;;  %v269_v45 = vld [vmem:[#allocation2] ss:$3 sm:$0xff] }
 0x112   :  { %261 = vst.msk [vmem:[#allocation2 + $0x20] sm:$0xff] %vm256_vm1, %v249_v14  ;;  %v217_v18 = vadd.f32 %v1255_v52, %v216_v15  ;;  %290 = vrot.lane.b32.xlu1 %v277_v16, %s1036_s11  ;;  %282 = vrot.lane.b32.xlu0 %v273_v17, %s1037_s12 }
 0x113   :  { %v218_v19 = vpop.f32.mrf.mxu0 }
 0x114   :  { %v250_v20 = vmax.f32 %v217_v18, 0.0 }
 0x115   :  { %v221_v21 = vpop.f32.mrf.mxu0 }
 0x116   :  { %262 = vst.msk [vmem:[#allocation2 + $0x28] sm:$0xff] %vm256_vm1, %v250_v20  ;;  %v222_v22 = vadd.f32 %v1255_v52, %v221_v21 }
 0x117   :  { %v223_v23 = vpop.f32.mrf.mxu0 }
 0x118   :  { %v251_v24 = vmax.f32 %v222_v22, 0.0 }
 0x119   :  { %v226_v25 = vpop.f32.mrf.mxu0  ;;  %v279_v26 = vld [vmem:[#allocation2 + $0x1a] ss:$3 sm:$0x1f]  ;;  %v275_v27 = vld [vmem:[#allocation2 + $0x19] ss:$3 sm:$0x1f] }
 0x11a   :  { %263 = vst.msk [vmem:[#allocation2 + $0x30] sm:$0xff] %vm256_vm1, %v251_v24  ;;  %v227_v28 = vadd.f32 %v1255_v52, %v226_v25  ;;  %292 = vrot.lane.b32.xlu1 %v279_v26, %s1036_s11  ;;  %284 = vrot.lane.b32.xlu0 %v275_v27, %s1037_s12  ;;  %v271_v49 = vld [vmem:[#allocation2 + $0x18] ss:$3 sm:$0x1f] }
 0x11b   :  { %v228_v29 = vpop.f32.mrf.mxu0 }
 0x11c   :  { %v252_v30 = vmax.f32 %v227_v28, 0.0 }
 0x11d   :  { %v231_v31 = vpop.f32.mrf.mxu0 }
 0x11e   :  { %264 = vst.msk [vmem:[#allocation2 + $0x38] sm:$0xff] %vm256_vm1, %v252_v30  ;;  %v232_v32 = vadd.f32 %v1255_v52, %v231_v31 }
 0x11f   :  { %v233_v33 = vpop.f32.mrf.mxu0 }
 0x120   :  { %v253_v34 = vmax.f32 %v232_v32, 0.0  ;;  %v55_v33 = vld [vmem:[%s1446_s1 + $0x158] sm:$0xff] }
 0x121   :  { %v236_v35 = vpop.f32.mrf.mxu0 }
 0x122   :  { %265 = vst.msk [vmem:[#allocation2 + $0x40] sm:$0xff] %vm256_vm1, %v253_v34  ;;  %v237_v36 = vadd.f32 %v1255_v52, %v236_v35  ;;  %v54_v34 = vld [vmem:[%s1446_s1 + $0x150] sm:$0xff] }
 0x123   :  { %v238_v37 = vpop.f32.mrf.mxu0 }
 0x124   :  { %v254_v38 = vmax.f32 %v237_v36, 0.0  ;;  %v885_v37 = vld [vmem:[%s1446_s1 + $0x182] ss:$0 sm:$0xff] }
 0x125   :  { %v397_v39 = vld [vmem:[#allocation2 + $0x2a] ss:$3 sm:$0xff] }
 0x126   :  { %266 = vst.msk [vmem:[#allocation2 + $0x48] sm:$0xff] %vm256_vm1, %v254_v38  ;;  %406 = vrot.lane.b32.xlu0 %v397_v39, %s1037_s12 }
 0x129   :  { %v401_v40 = vld [vmem:[#allocation2 + $0x2b] ss:$3 sm:$0xff] }
 0x12a   :  { %414 = vrot.lane.b32.xlu0 %v401_v40, %s1036_s11 }
 0x12d   :  { %v399_v41 = vld [vmem:[#allocation2 + $0x42] ss:$3 sm:$0x1f]  ;;  %v403_v42 = vld [vmem:[#allocation2 + $0x43] ss:$3 sm:$0x1f] }
 0x12e   :  { %408 = vrot.lane.b32.xlu1 %v399_v41, %s1037_s12  ;;  %v395_v59 = vld [vmem:[#allocation2 + $0x41] ss:$3 sm:$0x1f] }
 0x132   :  { %416 = vrot.lane.b32.xlu1 %v403_v42, %s1036_s11 }
 0x184   :  { %v291_v43 = vpop.permute.xlu1 %290  ;;  %v283_v44 = vpop.permute.xlu0 %282 }
 0x185   :  { %v296_v46 = vsel %vm256_vm1, %v269_v45, %v283_v44  ;;  %v59_v45 = vld [vmem:[%s1446_s1 + $0x178] sm:$0xff] }
 0x186   :  { %v299_v47 = vsel %vm298_vm2, %v296_v46, %v291_v43 }
 0x187   :  { %942 = vmatprep.mubr.msk.f32.mxu1 %vm305_vm3, %v299_v47  ;;  %v58_v47 = vld [vmem:[%s1446_s1 + $0x170] sm:$0xff] }
 0x18c   :  { %v293_v48 = vpop.permute.xlu1 %292  ;;  %v285_v50 = vpop.permute.xlu0 %284 }
 0x18d   :  { %v297_v52 = vsel %vm256_vm1, %v271_v49, %v285_v50  ;;  %v86_v49 = vld [vmem:[%s1445_s0 + $0xa8] sm:$0x3]  ;;  %v85_v50 = vld [vmem:[%s1445_s0 + $0xa0] sm:$0x3] }
 0x18e   :  { %v300_v53 = vsel %vm298_vm2, %v297_v52, %v293_v48  ;;  %v57_v48 = vld [vmem:[%s1446_s1 + $0x168] sm:$0xff]  ;;  %v56_v52 = vld [vmem:[%s1446_s1 + $0x160] sm:$0xff]  ;;  %879 = vmatprep.mubr.msk.f32.mxu0 %vm91_vm0, %v86_v49 }
 0x18f   :  { %943 = vmatmul.mubr.msk.f32.vlgmr.msra.gmra.mxu1 %vm305_vm3, %v300_v53  ;;  %240 = vmatmul.mubr.f32.gmra.mxu0 %v85_v50  ;;  %v888_v53 = vld [vmem:[%s1446_s1 + $0x183] ss:$0 sm:$0xff] }
 0x190   :  { %946 = vmatpush3.msra.mxu1 %v1248_v51  ;;  %v393_v51 = vld [vmem:[#allocation2 + $0x29] ss:$3 sm:$0xff] }
 0x191   :  { %947 = vmatprep.subr.mxu1 %v1263_v61 }
 0x192   :  { %948 = vmatpush3.msra.mxu1 %v1263_v61 }
 0x193   :  { %949 = vmatprep.subr.mxu1 %v1269_v63 }
 0x194   :  { %950 = vmatpush3.msra.mxu1 %v1269_v63  ;;  %v53_v63 = vld [vmem:[%s1446_s1 + $0x148] sm:$0xff] }
 0x195   :  { %951 = vmatprep.subr.mxu1 %v1278_v3 }
 0x196   :  { %952 = vmatpush3.msra.mxu1 %v1278_v3  ;;  %v50_v3 = vld [vmem:[%s1446_s1 + $0x130] sm:$0xff] }
 0x197   :  { %953 = vmatprep.subr.mxu1 %v1284_v5 }
 0x198   :  { %v407_v54 = vpop.permute.xlu0 %406  ;;  %954 = vmatpush3.msra.mxu1 %v1284_v5  ;;  %v880_v5 = vld [vmem:[%s1446_s1 + $0x181] ss:$0 sm:$0xff] }
 0x199   :  { %955 = vmatprep.subr.mxu1 %v1295_v11  ;;  %v420_v55 = vsel %vm256_vm1, %v393_v51, %v407_v54 }
 0x19a   :  { %956 = vmatpush3.msra.mxu1 %v1295_v11  ;;  %v48_v11 = vld [vmem:[%s1446_s1 + $0x120] sm:$0xff] }
 0x19b   :  { %960 = vmatprep.subr.mxu1 %v1035_v1 }
 0x19c   :  { %v415_v56 = vpop.permute.xlu0 %414 }
 0x19d   :  { %v422_v57 = vsel %vm298_vm2, %v420_v55, %v415_v56 }
 0x19e   :  { %957 = vmatprep.mubr.msk.f32.mxu1 %vm305_vm3, %v422_v57 }
 0x1a0   :  { %v409_v58 = vpop.permute.xlu1 %408 }
 0x1a1   :  { %v421_v60 = vsel %vm256_vm1, %v395_v59, %v409_v58  ;;  %v890_v59 = vld [vmem:[%s1446_s1 + $0x184] ss:$0 sm:$0xff] }
 0x1a4   :  { %v417_v61 = vpop.permute.xlu1 %416 }
 0x1a5   :  { %v423_v62 = vsel %vm298_vm2, %v421_v60, %v417_v61 }
 0x1a6   :  { %958 = vmatmul.mubr.msk.f32.vlgmr.msra.gmra.mxu1 %vm305_vm3, %v423_v62 }
 0x1a7   :  { %961 = vmatpush3.msra.mxu1 %v53_v63  ;;  %972 = vmatprep.mubr.msk.f32.mxu1 %vm1038_vm5, %v1035_v1 }
 0x1a8   :  { %962 = vmatprep.subr.mxu1 %v1035_v1 }
 0x1a9   :  { %963 = vmatpush3.msra.mxu1 %v52_v0 }
 0x1aa   :  { %964 = vmatprep.subr.mxu1 %v1035_v1 }
 0x1ab   :  { %965 = vmatpush3.msra.mxu1 %v51_v2 }
 0x1ac   :  { %966 = vmatprep.subr.mxu1 %v1035_v1 }
 0x1ad   :  { %967 = vmatpush3.msra.mxu1 %v50_v3 }
 0x1ae   :  { %968 = vmatprep.subr.mxu1 %v1035_v1 }
 0x1af   :  { %969 = vmatpush3.msra.mxu1 %v49_v4 }
 0x1b0   :  { %970 = vmatprep.subr.mxu1 %v1035_v1 }
 0x1b1   :  { %971 = vmatpush3.msra.mxu1 %v48_v11 }
 0x1b2   :  { %975 = vmatprep.subr.mxu1 %v1035_v1 }
 0x24f   :  { %v944_v6 = vpop.f32.mrf.mxu1  ;;  %v241_v57 = vpop.f32.mrf.mxu0 }
 0x250   :  { %v384_v7 = vadd.f32 %v944_v6, %v880_v5 }
 0x251   :  { %v378_v8 = vpop.f32.mrf.mxu1  ;;  %v243_v58 = vpop.f32.mrf.mxu0 }
 0x252   :  { %v388_v9 = vmax.f32 %v384_v7, 0.0  ;;  %v379_v10 = vadd.f32 %v880_v5, %v378_v8 }
 0x254   :  { %391 = vst.msk [vmem:[#allocation3 + $0x8] sm:$0x1f] %vm390_vm4, %v388_v9  ;;  %v387_v12 = vmax.f32 %v379_v10, 0.0 }
 0x256   :  { %389 = vst.msk [vmem:[#allocation3] sm:$0xff] %vm256_vm1, %v387_v12 }
 0x25d   :  { %v513_v13 = vld [vmem:[#allocation3 + $0x2] ss:$3 sm:$0xf]  ;;  %v511_v14 = vld [vmem:[#allocation3 + $0x1] ss:$3 sm:$0xf] }
 0x25e   :  { %519 = vrot.lane.b32.xlu1 %v513_v13, %s1036_s11  ;;  %515 = vrot.lane.b32.xlu0 %v511_v14, %s1037_s12  ;;  %v509_v25 = vld [vmem:[#allocation3] ss:$3 sm:$0xf] }
 0x266   :  { %v959_v15 = vpop.f32.mrf.mxu1 }
 0x267   :  { %v502_v16 = vadd.f32 %v959_v15, %v880_v5 }
 0x268   :  { %v496_v17 = vpop.f32.mrf.mxu1 }
 0x269   :  { %v506_v18 = vmax.f32 %v502_v16, 0.0  ;;  %v497_v19 = vadd.f32 %v880_v5, %v496_v17 }
 0x26b   :  { %508 = vst.msk [vmem:[#allocation3 + $0x15] sm:$0x1f] %vm390_vm4, %v506_v18  ;;  %v505_v20 = vmax.f32 %v497_v19, 0.0 }
 0x26d   :  { %507 = vst.msk [vmem:[#allocation3 + $0xd] sm:$0xff] %vm256_vm1, %v505_v20 }
 0x274   :  { %v607_v21 = vld [vmem:[#allocation3 + $0xf] ss:$3 sm:$0xf]  ;;  %v605_v22 = vld [vmem:[#allocation3 + $0xe] ss:$3 sm:$0xf] }
 0x275   :  { %613 = vrot.lane.b32.xlu1 %v607_v21, %s1036_s11  ;;  %609 = vrot.lane.b32.xlu0 %v605_v22, %s1037_s12  ;;  %v603_v29 = vld [vmem:[#allocation3 + $0xd] ss:$3 sm:$0xf] }
 0x2d0   :  { %v520_v23 = vpop.permute.xlu1 %519  ;;  %v516_v24 = vpop.permute.xlu0 %515 }
 0x2d1   :  { %v522_v26 = vsel %vm256_vm1, %v509_v25, %v516_v24 }
 0x2d2   :  { %v523_v27 = vsel %vm298_vm2, %v522_v26, %v520_v23 }
 0x2d3   :  { %973 = vmatmul.mubr.msk.f32.vlgmr.msra.gmra.mxu1 %vm305_vm3, %v523_v27 }
 0x2d4   :  { %976 = vmatpush3.msra.mxu1 %v53_v63  ;;  %987 = vmatprep.mubr.msk.f32.mxu1 %vm1038_vm5, %v1035_v1 }
 0x2d5   :  { %977 = vmatprep.subr.mxu1 %v1035_v1 }
 0x2d6   :  { %978 = vmatpush3.msra.mxu1 %v52_v0 }
 0x2d7   :  { %979 = vmatprep.subr.mxu1 %v1035_v1 }
 0x2d8   :  { %980 = vmatpush3.msra.mxu1 %v51_v2 }
 0x2d9   :  { %981 = vmatprep.subr.mxu1 %v1035_v1 }
 0x2da   :  { %982 = vmatpush3.msra.mxu1 %v50_v3 }
 0x2db   :  { %983 = vmatprep.subr.mxu1 %v1035_v1 }
 0x2dc   :  { %984 = vmatpush3.msra.mxu1 %v49_v4 }
 0x2dd   :  { %985 = vmatprep.subr.mxu1 %v1035_v1 }
 0x2de   :  { %986 = vmatpush3.msra.mxu1 %v48_v11 }
 0x2df   :  { %990 = vmatprep.subr.mxu1 %v1035_v1 }
 0x2e7   :  { %v614_v28 = vpop.permute.xlu1 %613  ;;  %v610_v30 = vpop.permute.xlu0 %609 }
 0x2e8   :  { %v616_v31 = vsel %vm256_vm1, %v603_v29, %v610_v30 }
 0x2e9   :  { %v617_v32 = vsel %vm298_vm2, %v616_v31, %v614_v28 }
 0x2ea   :  { %988 = vmatmul.mubr.msk.f32.vlgmr.msra.gmra.mxu1 %vm305_vm3, %v617_v32 }
 0x2eb   :  { %994 = vmatprep.mubr.msk.f32.mxu1 %vm1038_vm5, %v1035_v1  ;;  %991 = vmatpush3.msra.mxu1 %v55_v33 }
 0x2ec   :  { %992 = vmatprep.subr.mxu1 %v1035_v1 }
 0x2ed   :  { %993 = vmatpush3.msra.mxu1 %v54_v34 }
 0x2ee   :  { %997 = vmatprep.subr.mxu1 %v1035_v1 }
 0x393   :  { %v597_v35 = vpop.f32.mrf.mxu1 }
 0x394   :  { %v598_v39 = vadd.f32 %v885_v37, %v597_v35 }
 0x395   :  { %v974_v36 = vpop.f32.mrf.mxu1 }
 0x396   :  { %v601_v43 = vmax.f32 %v598_v39, 0.0 }
 0x3aa   :  { %v687_v38 = vpop.f32.mrf.mxu1 }
 0x3ab   :  { %v688_v40 = vadd.f32 %v885_v37, %v687_v38 }
 0x3ac   :  { %v989_v41 = vpop.f32.mrf.mxu1 }
 0x3ad   :  { %v691_v42 = vmax.f32 %v688_v40, 0.0 }
 0x3af   :  { %v693_v44 = vrot.slane %v691_v42, 4 }
 0x3b1   :  { %v696_v46 = vsel %vm695_vm6, %v601_v43, %v693_v44 }
 0x3b2   :  { %995 = vmatmul.mubr.msk.f32.vlgmr.msra.gmra.mxu1 %vm256_vm1, %v696_v46 }
 0x3b3   :  { %998 = vmatpush3.msra.mxu1 %v59_v45  ;;  %1005 = vmatprep.mubr.msk.f32.mxu1 %vm1038_vm5, %v1035_v1 }
 0x3b4   :  { %999 = vmatprep.subr.mxu1 %v1035_v1 }
 0x3b5   :  { %1000 = vmatpush3.msra.mxu1 %v58_v47 }
 0x3b6   :  { %1001 = vmatprep.subr.mxu1 %v1035_v1 }
 0x3b7   :  { %1002 = vmatpush3.msra.mxu1 %v57_v48 }
 0x3b8   :  { %1003 = vmatprep.subr.mxu1 %v1035_v1 }
 0x3b9   :  { %1004 = vmatpush3.msra.mxu1 %v56_v52 }
 0x472   :  { %v770_v54 = vpop.f32.mrf.mxu1 }
 0x473   :  { %v771_v51 = vadd.f32 %v888_v53, %v770_v54 }
 0x474   :  { %v996_v55 = vpop.f32.mrf.mxu1 }
 0x475   :  { %v774_v56 = vmax.f32 %v771_v51, 0.0 }
 0x477   :  { %1006 = vmatmul.mubr.msk.f32.vlgmr.msra.gmra.mxu1 %vm298_vm2, %v774_v56 }
 0x537   :  { %v848_v60 = vpop.f32.mrf.mxu1 }
 0x538   :  { %v849_v1 = vadd.f32 %v890_v59, %v848_v60 }
 0x539   :  { %v1007_v61 = vpop.f32.mrf.mxu1 }
 0x53a   :  { %v852_v62 = vmax.f32 %v849_v1, 0.0 }
 0x53c   :  { %853 = vst.msk [vmem:[#allocation4] sm:$0xff] %vm298_vm2, %v852_v62 }
 0x53d   :  { %1024 = shalt.err (!%p1021_p4)
}
 0x53e   :  { %863 = dma.vmem_to_hbm [thread:$0]  %s861_s21, 128, %s1447_s2, [#allocation5]  }
 0x53f   :  { %1033 = dma.done.wait [#allocation5], 128  }
 0x540   :  { %1034 = vsyncadd [#allocation5], 4294967168 }
 0x541   :  { %867 = vsyncpa [#allocation5], 1 }

</bundles_post_ra>
